<compile_context>
chip_gen: v5e
topology: v5e:2x2
jax: 0.10.0
libtpu: 0.0.40
codegen_flags: <defaults>
</compile_context>

<pallas_src>
import math
import functools

import jax
import jax.numpy as jnp
from jax.experimental import pallas as pl
from jax.experimental.pallas import tpu as pltpu


def _round_up(x, m):
    return ((x + m - 1) // m) * m


def _dot_sim_kernel(t1_ref, t2_ref, out_ref, acc_ref, *, scale):
    # t1_ref: (Bb, tm, tk), t2_ref: (Bb, tk, tn), out_ref/acc_ref: (Bb, tm, tn)
    k = pl.program_id(3)

    @pl.when(k == 0)
    def _():
        acc_ref[...] = jnp.zeros_like(acc_ref)

    # Plain (M,K)@(K,N) per batch on the MXU, f32 accumulation.
    acc_ref[...] += jnp.einsum(
        "bmk,bkn->bmn",
        t1_ref[...],
        t2_ref[...],
        preferred_element_type=jnp.float32,
    )

    @pl.when(k == pl.num_programs(3) - 1)
    def _():
        res = acc_ref[...]
        if scale != 1.0:
            res = res * jnp.float32(scale)  # epilogue in f32, cast once on store
        out_ref[...] = res.astype(out_ref.dtype)


def dot_product_similarity(tensor_1, tensor_2, scale_output=False):
    """tensor_1: (B, M, D), tensor_2: (B, N, D) -> (B, M, N) == bmm(t1, t2^T)."""
    B, M, D = tensor_1.shape
    B2, N, D2 = tensor_2.shape
    assert B == B2 and D == D2, "incompatible shapes"

    # Compute dtype: floats pass through; integers are upcast to f32 (MXU int
    # support is not uniform across TPU generations).
    compute_dtype = jnp.result_type(tensor_1.dtype, tensor_2.dtype)
    if not jnp.issubdtype(compute_dtype, jnp.floating):
        compute_dtype = jnp.float32
    out_dtype = compute_dtype

    t1 = tensor_1.astype(compute_dtype)
    # Pre-transpose RHS once in the wrapper -> kernel sees a (K, N) operand.
    t2 = jnp.swapaxes(tensor_2.astype(compute_dtype), 1, 2)  # (B, D, N)

    # ---- tile-size selection (respect (sublane, 128) tiling) ----------------
    sublane = 16 if jnp.dtype(compute_dtype).itemsize == 2 else 8
    if M <= 512:
        Mp = _round_up(M, sublane)
        tm = Mp
    else:
        Mp = _round_up(M, 256)
        tm = 256
    Np = _round_up(N, 128)                                  # lane-dense output
    tn = 256 if Np % 256 == 0 else 128
    Dp = _round_up(D, 128)
    tk = 512 if Dp % 512 == 0 else (256 if Dp % 256 == 0 else 128)

    # Batch several matmuls per grid step when each one is tiny.
    if Mp * Np >= 128 * 256:
        Bb = 1
    else:
        Bb = min(B, max(1, (128 * 256) // (Mp * Np)), 8)
        while B % Bb:                                       # Bb must divide B
            Bb -= 1

    # ---- zero-pad to tiled shapes (zeros along D contribute nothing) --------
    t1 = jnp.pad(t1, ((0, 0), (0, Mp - M), (0, Dp - D)))
    t2 = jnp.pad(t2, ((0, 0), (0, Dp - D), (0, Np - N)))

    scale = 1.0 / math.sqrt(D) if scale_output else 1.0
    kernel = functools.partial(_dot_sim_kernel, scale=scale)

    grid = (B // Bb, Mp // tm, Np // tn, Dp // tk)

    itemsize = jnp.dtype(compute_dtype).itemsize
    cost = pl.CostEstimate(
        flops=2 * B * Mp * Np * Dp,
        transcendentals=0,
        bytes_accessed=(B * Mp * Dp + B * Dp * Np) * itemsize
        + B * Mp * Np * jnp.dtype(out_dtype).itemsize,
    )

    out_padded = pl.pallas_call(
        kernel,
        out_shape=jax.ShapeDtypeStruct((B, Mp, Np), out_dtype),
        grid_spec=pltpu.PrefetchScalarGridSpec(
            num_scalar_prefetch=0,
            grid=grid,
            in_specs=[
                pl.BlockSpec((Bb, tm, tk), lambda b, i, j, k: (b, i, k)),
                pl.BlockSpec((Bb, tk, tn), lambda b, i, j, k: (b, k, j)),
            ],
            out_specs=pl.BlockSpec((Bb, tm, tn), lambda b, i, j, k: (b, i, j)),
            scratch_shapes=[pltpu.VMEM((Bb, tm, tn), jnp.float32)],
        ),
        compiler_params=pltpu.CompilerParams(
            dimension_semantics=("parallel", "parallel", "parallel", "arbitrary"),
        ),
        cost_estimate=cost,
    )(t1, t2)

    # Slice off the padding.
    return out_padded[:, :M, :N]


if __name__ == "__main__":
    key = jax.random.PRNGKey(0)
    k1, k2 = jax.random.split(key)

    B, M, N, D = 2, 8, 8, 32
    tensor_1 = jax.random.normal(k1, (B, M, D), dtype=jnp.float32)
    tensor_2 = jax.random.normal(k2, (B, N, D), dtype=jnp.float32)

    # Run both scaled and unscaled variants of the module.
    out_unscaled = dot_product_similarity(tensor_1, tensor_2, scale_output=False)
    out_scaled = dot_product_similarity(tensor_1, tensor_2, scale_output=True)
    jax.block_until_ready(out_unscaled)
    jax.block_until_ready(out_scaled)

    # Reference check against plain JAX (same semantics as torch.bmm).
    ref = jnp.einsum("bmd,bnd->bmn", tensor_1, tensor_2)
    assert out_unscaled.shape == (B, M, N)
    assert jnp.allclose(out_unscaled, ref, atol=1e-5, rtol=1e-5)
    assert jnp.allclose(out_scaled, ref / math.sqrt(D), atol=1e-5, rtol=1e-5)

    print("KERNEL_OK")
</pallas_src>

<mosaic_0001>
module attributes {stable_mosaic.version = 11 : i64} {
  func.func @_dot_sim_kernel(%arg0: i32, %arg1: i32, %arg2: i32, %arg3: i32, %arg4: memref<2x8x128xf32, #tpu.memory_space<vmem>>, %arg5: memref<2x128x128xf32, #tpu.memory_space<vmem>>, %arg6: memref<2x8x128xf32, #tpu.memory_space<vmem>>, %arg7: memref<2x8x128xf32, #tpu.memory_space<vmem>>) attributes {dimension_semantics = [#tpu.dimension_semantics<parallel>, #tpu.dimension_semantics<parallel>, #tpu.dimension_semantics<parallel>, #tpu.dimension_semantics<arbitrary>], iteration_bounds = array<i64: 1, 1, 1, 1>, scalar_prefetch = 0 : i64, scratch_operands = 1 : i64, tpu.core_type = #tpu.core_type<tc>, window_params = [{transform_indices = @transform_0, window_bounds = array<i64: 2, 8, 128>}, {transform_indices = @transform_1, window_bounds = array<i64: 2, 128, 128>}, {transform_indices = @transform_2, window_bounds = array<i64: 2, 8, 128>}]} {
    %c0_i32 = arith.constant 0 : i32
    %0 = arith.cmpi eq, %arg3, %c0_i32 : i32
    %1 = arith.extui %0 : i1 to i32
    %c0_i32_0 = arith.constant 0 : i32
    %2 = arith.cmpi ne, %1, %c0_i32_0 : i32
    scf.if %2 {
      %cst_14 = arith.constant 0.000000e+00 : f32
      %12 = vector.broadcast %cst_14 : f32 to vector<2x8x128xf32>
      %c0_15 = arith.constant 0 : index
      %c0_16 = arith.constant 0 : index
      %c0_17 = arith.constant 0 : index
      %13 = vector.load %arg7[%c0_15, %c0_16, %c0_17] : memref<2x8x128xf32, #tpu.memory_space<vmem>>, vector<2x8x128xf32>
      tpu.vector_store %arg7[%c0_15, %c0_16, %c0_17], %12 {strides = array<i32>} : memref<2x8x128xf32, #tpu.memory_space<vmem>>, vector<2x8x128xf32>,
    } else {
    }
    %c0 = arith.constant 0 : index
    %c0_1 = arith.constant 0 : index
    %c0_2 = arith.constant 0 : index
    %3 = vector.load %arg7[%c0, %c0_1, %c0_2] : memref<2x8x128xf32, #tpu.memory_space<vmem>>, vector<2x8x128xf32>
    %c0_3 = arith.constant 0 : index
    %c0_4 = arith.constant 0 : index
    %c0_5 = arith.constant 0 : index
    %4 = vector.load %arg4[%c0_3, %c0_4, %c0_5] : memref<2x8x128xf32, #tpu.memory_space<vmem>>, vector<2x8x128xf32>
    %c0_6 = arith.constant 0 : index
    %c0_7 = arith.constant 0 : index
    %c0_8 = arith.constant 0 : index
    %5 = vector.load %arg5[%c0_6, %c0_7, %c0_8] : memref<2x128x128xf32, #tpu.memory_space<vmem>>, vector<2x128x128xf32>
    "tpu.trace_start"() <{level = 10 : i32, message = "bmk,bkn->bmn"}> : () -> ()
    %cst = arith.constant dense<0.000000e+00> : vector<2x8x128xf32>
    %6 = tpu.matmul %4, %5, %cst {dimension_numbers = #tpu.dot_dimension_numbers<[2], [1], [1], [2], [0, 0, 0, 1, 1, 2], [0], [0]>} : vector<2x8x128xf32>, vector<2x128x128xf32>, vector<2x8x128xf32> -> vector<2x8x128xf32>
    "tpu.trace_stop"() : () -> ()
    %7 = arith.addf %3, %6 : vector<2x8x128xf32>
    %c0_9 = arith.constant 0 : index
    %c0_10 = arith.constant 0 : index
    %c0_11 = arith.constant 0 : index
    %8 = vector.load %arg7[%c0_9, %c0_10, %c0_11] : memref<2x8x128xf32, #tpu.memory_space<vmem>>, vector<2x8x128xf32>
    tpu.vector_store %arg7[%c0_9, %c0_10, %c0_11], %7 {strides = array<i32>} : memref<2x8x128xf32, #tpu.memory_space<vmem>>, vector<2x8x128xf32>,
    %c0_i32_12 = arith.constant 0 : i32
    %9 = arith.cmpi eq, %arg3, %c0_i32_12 : i32
    %10 = arith.extui %9 : i1 to i32
    %c0_i32_13 = arith.constant 0 : i32
    %11 = arith.cmpi ne, %10, %c0_i32_13 : i32
    scf.if %11 {
      %c0_14 = arith.constant 0 : index
      %c0_15 = arith.constant 0 : index
      %c0_16 = arith.constant 0 : index
      %12 = vector.load %arg7[%c0_14, %c0_15, %c0_16] : memref<2x8x128xf32, #tpu.memory_space<vmem>>, vector<2x8x128xf32>
      %c0_17 = arith.constant 0 : index
      %c0_18 = arith.constant 0 : index
      %c0_19 = arith.constant 0 : index
      %13 = vector.load %arg6[%c0_17, %c0_18, %c0_19] : memref<2x8x128xf32, #tpu.memory_space<vmem>>, vector<2x8x128xf32>
      tpu.vector_store %arg6[%c0_17, %c0_18, %c0_19], %12 {strides = array<i32>} : memref<2x8x128xf32, #tpu.memory_space<vmem>>, vector<2x8x128xf32>,
    } else {
    }
    return
  }
  func.func @transform_0(%arg0: i32, %arg1: i32, %arg2: i32, %arg3: i32) -> (i32, i32, i32) {
    %c0_i32 = arith.constant 0 : i32
    return %arg0, %arg1, %arg3 : i32, i32, i32
  }
  func.func @transform_1(%arg0: i32, %arg1: i32, %arg2: i32, %arg3: i32) -> (i32, i32, i32) {
    %c0_i32 = arith.constant 0 : i32
    return %arg0, %arg3, %arg2 : i32, i32, i32
  }
  func.func @transform_2(%arg0: i32, %arg1: i32, %arg2: i32, %arg3: i32) -> (i32, i32, i32) {
    %c0_i32 = arith.constant 0 : i32
    return %arg0, %arg1, %arg2 : i32, i32, i32
  }
}

</mosaic_0001>

<bundles_post_ra>
// kernel: tpu_custom_call.1
= control target key start
LH: loop header
LB: loop body
LE: loop exit
PB: predicated region body
PF: predicated region fallthrough
CT: control target
= control target key end

     0   :  { %7 = vsyncpa [#allocation4], 0  ;;  %s278_s0 = inlined_call_operand.hbm [shape: f32[2,8,128], index: 0, kind: input, shape index: {}]   ;;  %s279_s1 = inlined_call_operand.hbm [shape: f32[2,128,128], index: 1, kind: input, shape index: {}]   ;;  %s280_s2 = inlined_call_operand.hbm [shape: f32[2,8,128], index: 2, kind: output, shape index: {}]  }
   0x1   :  { %8 = vsyncpa [#allocation7], 0 }
   0x2   :  { %9 = vsyncpa [#allocation5], 0  ;;  %s14_s11 = sshll.u32 %s278_s0, 4  ;;  %s240_s12 = smov [#allocation3]   ;;  %s15_s11 = int_to_ptr.hbm [resolvable:$true] %s14_s11 }
   0x3   :  { %s16_s13 = sshll.u32 %s240_s12, 4  ;;  %s27_s16 = sshll.u32 %s279_s1, 4  ;;  %s17_s13 = int_to_ptr.vmem [resolvable:$true] %s16_s13  ;;  %s28_s16 = int_to_ptr.hbm [resolvable:$true] %s27_s16 }
   0x4   :  { %s241_s17 = smov 128   ;;  %s242_s18 = smov 8  }
   0x5   :  { %22 = dma.hbm_to_vmem [thread:$0]  %s15_s11, 256, %s17_s13, [#allocation4], %s241_s17, %s241_s17, %s242_s18  }
   0x6   :  { %s243_s19 = smov [#allocation6]  }
   0x7   :  { %s29_s20 = sshll.u32 %s243_s19, 4  ;;  %s30_s20 = int_to_ptr.vmem [resolvable:$true] %s29_s20 }
   0x8   :  { %35 = dma.hbm_to_vmem [thread:$0]  %s28_s16, 4096, %s30_s20, [#allocation7], %s241_s17, %s241_s17, %s242_s18  }
   0x9   :  { %234 = dma.done.wait [#allocation4], 256  }
   0xa   :  { %235 = vsyncadd [#allocation4], 4294967040 }
   0xb   :  { %236 = dma.done.wait [#allocation7], 4096  }
   0xc   :  { %237 = vsyncadd [#allocation7], 4294963200  ;;  %v69_v0 = vld [vmem:[#allocation6 + $0x78] sm:$0xff]  ;;  %v68_v2 = vld [vmem:[#allocation6 + $0x70] sm:$0xff]  ;;  %s244_s0 = smov [#allocation8]   ;;  %s143_s23 = sshll.u32 %s280_s2, 4  ;;  %s144_s23 = int_to_ptr.hbm [resolvable:$true] %s143_s23 }
   0xd   :  { %v85_v1 = vld [vmem:[#allocation6 + $0xf8] sm:$0xff]  ;;  %86 = vmatpush.msra.mxu0 %v69_v0  ;;  %v84_v3 = vld [vmem:[#allocation6 + $0xf0] sm:$0xff]  ;;  %v67_v4 = vld [vmem:[#allocation6 + $0x68] sm:$0xff]  ;;  %s141_s1 = sshll.u32 %s244_s0, 4  ;;  %s142_s1 = int_to_ptr.vmem [resolvable:$true] %s141_s1 }
   0xe   :  { %106 = vmatpush.msra.mxu1 %v85_v1  ;;  %v83_v5 = vld [vmem:[#allocation6 + $0xe8] sm:$0xff]  ;;  %v66_v6 = vld [vmem:[#allocation6 + $0x60] sm:$0xff]  ;;  %v65_v8 = vld [vmem:[#allocation6 + $0x58] sm:$0xff] }
   0xf   :  { %87 = vmatpush.msra.mxu0 %v68_v2  ;;  %v82_v7 = vld [vmem:[#allocation6 + $0xe0] sm:$0xff]  ;;  %v81_v9 = vld [vmem:[#allocation6 + $0xd8] sm:$0xff]  ;;  %v64_v10 = vld [vmem:[#allocation6 + $0x50] sm:$0xff] }
  0x10   :  { %107 = vmatpush.msra.mxu1 %v84_v3  ;;  %v80_v11 = vld [vmem:[#allocation6 + $0xd0] sm:$0xff]  ;;  %v63_v12 = vld [vmem:[#allocation6 + $0x48] sm:$0xff]  ;;  %v62_v14 = vld [vmem:[#allocation6 + $0x40] sm:$0xff] }
  0x11   :  { %88 = vmatpush.msra.mxu0 %v67_v4  ;;  %v79_v13 = vld [vmem:[#allocation6 + $0xc8] sm:$0xff]  ;;  %v78_v15 = vld [vmem:[#allocation6 + $0xc0] sm:$0xff]  ;;  %v61_v16 = vld [vmem:[#allocation6 + $0x38] sm:$0xff] }
  0x12   :  { %108 = vmatpush.msra.mxu1 %v83_v5  ;;  %v77_v17 = vld [vmem:[#allocation6 + $0xb8] sm:$0xff]  ;;  %v60_v18 = vld [vmem:[#allocation6 + $0x30] sm:$0xff]  ;;  %v59_v20 = vld [vmem:[#allocation6 + $0x28] sm:$0xff] }
  0x13   :  { %89 = vmatpush.msra.mxu0 %v66_v6  ;;  %v76_v19 = vld [vmem:[#allocation6 + $0xb0] sm:$0xff]  ;;  %v75_v21 = vld [vmem:[#allocation6 + $0xa8] sm:$0xff]  ;;  %v58_v22 = vld [vmem:[#allocation6 + $0x20] sm:$0xff] }
  0x14   :  { %109 = vmatpush.msra.mxu1 %v82_v7  ;;  %v74_v23 = vld [vmem:[#allocation6 + $0xa0] sm:$0xff]  ;;  %v57_v24 = vld [vmem:[#allocation6 + $0x18] sm:$0xff]  ;;  %v56_v26 = vld [vmem:[#allocation6 + $0x10] sm:$0xff] }
  0x15   :  { %90 = vmatpush.msra.mxu0 %v65_v8  ;;  %v73_v25 = vld [vmem:[#allocation6 + $0x98] sm:$0xff]  ;;  %v72_v27 = vld [vmem:[#allocation6 + $0x90] sm:$0xff]  ;;  %v55_v28 = vld [vmem:[#allocation6 + $0x8] sm:$0xff] }
  0x16   :  { %110 = vmatpush.msra.mxu1 %v81_v9  ;;  %v71_v29 = vld [vmem:[#allocation6 + $0x88] sm:$0xff]  ;;  %v54_v30 = vld [vmem:[#allocation6] sm:$0xff]  ;;  %v52_v32 = vld [vmem:[#allocation3] sm:$0xff] }
  0x17   :  { %91 = vmatpush.msra.mxu0 %v64_v10  ;;  %v70_v31 = vld [vmem:[#allocation6 + $0x80] sm:$0xff]  ;;  %v53_v33 = vld [vmem:[#allocation3 + $0x8] sm:$0xff] }
  0x18   :  { %111 = vmatpush.msra.mxu1 %v80_v11 }
  0x19   :  { %92 = vmatpush.msra.mxu0 %v63_v12 }
  0x1a   :  { %112 = vmatpush.msra.mxu1 %v79_v13 }
  0x1b   :  { %93 = vmatpush.msra.mxu0 %v62_v14 }
  0x1c   :  { %113 = vmatpush.msra.mxu1 %v78_v15 }
  0x1d   :  { %94 = vmatpush.msra.mxu0 %v61_v16 }
  0x1e   :  { %114 = vmatpush.msra.mxu1 %v77_v17 }
  0x1f   :  { %95 = vmatpush.msra.mxu0 %v60_v18 }
  0x20   :  { %115 = vmatpush.msra.mxu1 %v76_v19 }
  0x21   :  { %96 = vmatpush.msra.mxu0 %v59_v20 }
  0x22   :  { %116 = vmatpush.msra.mxu1 %v75_v21 }
  0x23   :  { %97 = vmatpush.msra.mxu0 %v58_v22 }
  0x24   :  { %117 = vmatpush.msra.mxu1 %v74_v23 }
  0x25   :  { %98 = vmatpush.msra.mxu0 %v57_v24 }
  0x26   :  { %118 = vmatpush.msra.mxu1 %v73_v25 }
  0x27   :  { %99 = vmatpush.msra.mxu0 %v56_v26 }
  0x28   :  { %119 = vmatpush.msra.mxu1 %v72_v27 }
  0x29   :  { %100 = vmatpush.msra.mxu0 %v55_v28 }
  0x2a   :  { %120 = vmatpush.msra.mxu1 %v71_v29 }
  0x2b   :  { %101 = vmatpush.msra.mxu0 %v54_v30 }
  0x2c   :  { %121 = vmatpush.msra.mxu1 %v70_v31  ;;  %102 = vmatmul.f32.vlgmr.msra.gmra.mxu0 %v52_v32 }
  0x2d   :  { %122 = vmatmul.f32.vlgmr.msra.gmra.mxu1 %v53_v33 }
  0xa9   :  { %v103_v34 = vpop.f32.mrf.mxu0 }
  0xaa   :  { %v123_v35 = vpop.f32.mrf.mxu1  ;;  %135 = vst [vmem:[#allocation8] sm:$0xff] %v103_v34 }
  0xab   :  { %136 = vst [vmem:[#allocation8 + $0x8] sm:$0xff] %v123_v35 }
  0xac   :  { %149 = dma.vmem_to_hbm [thread:$0]  %s142_s1, 256, %s144_s23, [#allocation5], %s241_s17, %s241_s17, %s242_s18  }
  0xad   :  { %238 = dma.done.wait [#allocation5], 256  }
  0xae   :  { %239 = vsyncadd [#allocation5], 4294967040 }
  0xaf   :  { %154 = vsyncpa [#allocation4], 1 }
  0xb0   :  { %155 = vsyncpa [#allocation7], 1 }
  0xb1   :  { %156 = vsyncpa [#allocation5], 1 }

</bundles_post_ra>
